<compile_context>
chip_gen: v7x
topology: tpu7x:2x2x1
jax: 0.10.0
libtpu: 0.0.40
codegen_flags: <defaults>
</compile_context>

<pallas_src>
import functools

import jax
import jax.numpy as jnp
from jax.experimental import pallas as pl
from jax.experimental.pallas import tpu as pltpu

_LANE = 128      # lane width (last dim)
_SUBLANE = 8     # f32 sublane tile (second-to-last dim)
_MAX_TB = 256    # batch tile (matches 256-row MXU on v6e/v7x)


def _round_up(x, m):
    return ((x + m - 1) // m) * m


def _mlp_kernel(x_ref, *refs, num_layers, dot_dtype):
    """Fused MLP: ((x @ W0 + b0).relu ... @ Wn + bn).tanh, all in VMEM/vregs."""
    o_ref = refs[-1]
    wb = refs[:-1]
    x = x_ref[...]
    for li in range(num_layers):
        w = wb[2 * li][...]
        b = wb[2 * li + 1][...]          # (1, out) -> broadcasts over the batch tile
        y = jnp.dot(x.astype(dot_dtype), w.astype(dot_dtype),
                    preferred_element_type=jnp.float32) + b
        if li < num_layers - 1:
            x = jnp.maximum(y, 0.0)      # ReLU on hidden layers
        else:
            x = jnp.tanh(y)              # tanh on the output layer (f32 EUP)
    o_ref[...] = x.astype(o_ref.dtype)


def _pad2d(a, rows, cols):
    r, c = a.shape
    return jnp.pad(a, ((0, rows - r), (0, cols - c)))


def actor_forward(state, params, *, dot_dtype=jnp.float32):
    """maps state -> action. state: (B, state_size); params: list of (W(in,out), b(out))."""
    B, state_size = state.shape
    num_layers = len(params)
    action_size = params[-1][0].shape[1]

    # ---- batch tiling (pad batch to the tile, grid over batch, parallel axis) ----
    Bp = _round_up(B, _SUBLANE)
    if Bp > _MAX_TB:
        tb = _MAX_TB
        Bp = _round_up(B, tb)
    else:
        tb = Bp
    grid = (Bp // tb,)

    # ---- lane-dense padding of every feature dim to a multiple of 128 ----
    in_dims = [state_size] + [w.shape[1] for (w, _) in params[:-1]]
    out_dims = [w.shape[1] for (w, _) in params]
    in_pads = [_round_up(d, _LANE) for d in in_dims]
    out_pads = [_round_up(d, _LANE) for d in out_dims]

    x_pad = _pad2d(state, Bp, in_pads[0])

    flat_wb = []
    in_specs = [pl.BlockSpec((tb, in_pads[0]), lambda i: (i, 0))]
    for li, (w, b) in enumerate(params):
        wp = _pad2d(w, in_pads[li], out_pads[li])
        bp = _pad2d(b.reshape(1, -1), 1, out_pads[li])
        flat_wb += [wp, bp]
        in_specs.append(pl.BlockSpec(wp.shape, lambda i: (0, 0)))   # weights resident
        in_specs.append(pl.BlockSpec(bp.shape, lambda i: (0, 0)))   # bias resident

    out_pad = out_pads[-1]
    kernel = functools.partial(_mlp_kernel, num_layers=num_layers, dot_dtype=dot_dtype)

    out = pl.pallas_call(
        kernel,
        out_shape=jax.ShapeDtypeStruct((Bp, out_pad), jnp.float32),
        grid=grid,
        in_specs=in_specs,
        out_specs=pl.BlockSpec((tb, out_pad), lambda i: (i, 0)),
        compiler_params=pltpu.CompilerParams(dimension_semantics=("parallel",)),
    )(x_pad, *flat_wb)

    return out[:B, :action_size]


# Jitted entry point: single fused pallas_call per step, no per-step Python tracing.
actor_forward_jit = jax.jit(actor_forward)


def init_actor_params(state_size, action_size, hidden_layers, seed=42):
    """Deterministic init mirroring the PyTorch module:
       hidden weights ~ U(-1/sqrt(out_features), 1/sqrt(out_features))  (init_layers),
       output weights ~ U(-0.003, 0.003),
       biases keep default nn.Linear init ~ U(-1/sqrt(in_features), 1/sqrt(in_features))."""
    layer_sizes = [state_size] + list(hidden_layers)
    key = jax.random.PRNGKey(seed)
    params = []
    for h1, h2 in zip(layer_sizes[:-1], layer_sizes[1:]):
        key, kw, kb = jax.random.split(key, 3)
        lim_w = 1.0 / jnp.sqrt(jnp.float32(h2))
        lim_b = 1.0 / jnp.sqrt(jnp.float32(h1))
        w = jax.random.uniform(kw, (h1, h2), jnp.float32, -lim_w, lim_w)
        b = jax.random.uniform(kb, (h2,), jnp.float32, -lim_b, lim_b)
        params.append((w, b))
    key, kw, kb = jax.random.split(key, 3)
    h_last = layer_sizes[-1]
    w_out = jax.random.uniform(kw, (h_last, action_size), jnp.float32, -0.003, 0.003)
    lim_b = 1.0 / jnp.sqrt(jnp.float32(h_last))
    b_out = jax.random.uniform(kb, (action_size,), jnp.float32, -lim_b, lim_b)
    params.append((w_out, b_out))
    return params


if __name__ == "__main__":
    batch = 2
    state_size = 8
    action_size = 4
    hidden_layers = [32, 32]

    key = jax.random.PRNGKey(0)
    state = jax.random.normal(key, (batch, state_size), dtype=jnp.float32)

    params = init_actor_params(state_size, action_size, hidden_layers, seed=42)

    out = actor_forward_jit(state, params)
    out = jax.block_until_ready(out)

    # sanity: reference in plain JAX
    x_ref = state
    for (w, b) in params[:-1]:
        x_ref = jnp.maximum(x_ref @ w + b, 0.0)
    ref = jnp.tanh(x_ref @ params[-1][0] + params[-1][1])
    assert out.shape == (batch, action_size)
    assert jnp.allclose(out, ref, atol=1e-5), "mismatch vs reference"

    print("KERNEL_OK")
</pallas_src>

<mosaic_0001>
module attributes {stable_mosaic.version = 11 : i64} {
  func.func @_mlp_kernel(%arg0: i32, %arg1: memref<8x128xf32, #tpu.memory_space<vmem>>, %arg2: memref<128x128xf32, #tpu.memory_space<vmem>>, %arg3: memref<1x128xf32, #tpu.memory_space<vmem>>, %arg4: memref<128x128xf32, #tpu.memory_space<vmem>>, %arg5: memref<1x128xf32, #tpu.memory_space<vmem>>, %arg6: memref<128x128xf32, #tpu.memory_space<vmem>>, %arg7: memref<1x128xf32, #tpu.memory_space<vmem>>, %arg8: memref<8x128xf32, #tpu.memory_space<vmem>>) attributes {dimension_semantics = [#tpu.dimension_semantics<parallel>], iteration_bounds = array<i64: 1>, scalar_prefetch = 0 : i64, scratch_operands = 0 : i64, tpu.core_type = #tpu.core_type<tc>, window_params = [{transform_indices = @transform_0, window_bounds = array<i64: 8, 128>}, {pipeline_mode = #tpu.pipeline_mode<synchronous>, transform_indices = @transform_1, window_bounds = array<i64: 128, 128>}, {pipeline_mode = #tpu.pipeline_mode<synchronous>, transform_indices = @transform_2, window_bounds = array<i64: 1, 128>}, {pipeline_mode = #tpu.pipeline_mode<synchronous>, transform_indices = @transform_3, window_bounds = array<i64: 128, 128>}, {pipeline_mode = #tpu.pipeline_mode<synchronous>, transform_indices = @transform_4, window_bounds = array<i64: 1, 128>}, {pipeline_mode = #tpu.pipeline_mode<synchronous>, transform_indices = @transform_5, window_bounds = array<i64: 128, 128>}, {pipeline_mode = #tpu.pipeline_mode<synchronous>, transform_indices = @transform_6, window_bounds = array<i64: 1, 128>}, {transform_indices = @transform_7, window_bounds = array<i64: 8, 128>}]} {
    %c0 = arith.constant 0 : index
    %c0_0 = arith.constant 0 : index
    %0 = vector.load %arg1[%c0, %c0_0] : memref<8x128xf32, #tpu.memory_space<vmem>>, vector<8x128xf32>
    %c0_1 = arith.constant 0 : index
    %c0_2 = arith.constant 0 : index
    %1 = vector.load %arg2[%c0_1, %c0_2] : memref<128x128xf32, #tpu.memory_space<vmem>>, vector<128x128xf32>
    %c0_3 = arith.constant 0 : index
    %c0_4 = arith.constant 0 : index
    %2 = vector.load %arg3[%c0_3, %c0_4] : memref<1x128xf32, #tpu.memory_space<vmem>>, vector<1x128xf32>
    %cst = arith.constant dense<0.000000e+00> : vector<8x128xf32>
    %3 = tpu.matmul %0, %1, %cst {dimension_numbers = #tpu.dot_dimension_numbers<[1], [0], [0], [1], [0, 0, 1, 1], [], []>} : vector<8x128xf32>, vector<128x128xf32>, vector<8x128xf32> -> vector<8x128xf32>
    %4 = vector.broadcast %2 : vector<1x128xf32> to vector<8x128xf32>
    %5 = arith.addf %3, %4 : vector<8x128xf32>
    %cst_5 = arith.constant 0.000000e+00 : f32
    %6 = vector.broadcast %cst_5 : f32 to vector<8x128xf32>
    %7 = arith.maximumf %5, %6 : vector<8x128xf32>
    %c0_6 = arith.constant 0 : index
    %c0_7 = arith.constant 0 : index
    %8 = vector.load %arg4[%c0_6, %c0_7] : memref<128x128xf32, #tpu.memory_space<vmem>>, vector<128x128xf32>
    %c0_8 = arith.constant 0 : index
    %c0_9 = arith.constant 0 : index
    %9 = vector.load %arg5[%c0_8, %c0_9] : memref<1x128xf32, #tpu.memory_space<vmem>>, vector<1x128xf32>
    %cst_10 = arith.constant dense<0.000000e+00> : vector<8x128xf32>
    %10 = tpu.matmul %7, %8, %cst_10 {dimension_numbers = #tpu.dot_dimension_numbers<[1], [0], [0], [1], [0, 0, 1, 1], [], []>} : vector<8x128xf32>, vector<128x128xf32>, vector<8x128xf32> -> vector<8x128xf32>
    %11 = vector.broadcast %9 : vector<1x128xf32> to vector<8x128xf32>
    %12 = arith.addf %10, %11 : vector<8x128xf32>
    %cst_11 = arith.constant 0.000000e+00 : f32
    %13 = vector.broadcast %cst_11 : f32 to vector<8x128xf32>
    %14 = arith.maximumf %12, %13 : vector<8x128xf32>
    %c0_12 = arith.constant 0 : index
    %c0_13 = arith.constant 0 : index
    %15 = vector.load %arg6[%c0_12, %c0_13] : memref<128x128xf32, #tpu.memory_space<vmem>>, vector<128x128xf32>
    %c0_14 = arith.constant 0 : index
    %c0_15 = arith.constant 0 : index
    %16 = vector.load %arg7[%c0_14, %c0_15] : memref<1x128xf32, #tpu.memory_space<vmem>>, vector<1x128xf32>
    %cst_16 = arith.constant dense<0.000000e+00> : vector<8x128xf32>
    %17 = tpu.matmul %14, %15, %cst_16 {dimension_numbers = #tpu.dot_dimension_numbers<[1], [0], [0], [1], [0, 0, 1, 1], [], []>} : vector<8x128xf32>, vector<128x128xf32>, vector<8x128xf32> -> vector<8x128xf32>
    %18 = vector.broadcast %16 : vector<1x128xf32> to vector<8x128xf32>
    %19 = arith.addf %17, %18 : vector<8x128xf32>
    %20 = math.tanh %19 : vector<8x128xf32>
    %c0_17 = arith.constant 0 : index
    %c0_18 = arith.constant 0 : index
    %21 = vector.load %arg8[%c0_17, %c0_18] : memref<8x128xf32, #tpu.memory_space<vmem>>, vector<8x128xf32>
    tpu.vector_store %arg8[%c0_17, %c0_18], %20 {strides = array<i32>} : memref<8x128xf32, #tpu.memory_space<vmem>>, vector<8x128xf32>,
    return
  }
  func.func @transform_0(%arg0: i32) -> (i32, i32) {
    %c0_i32 = arith.constant 0 : i32
    %c0_i32_0 = arith.constant 0 : i32
    return %arg0, %c0_i32 : i32, i32
  }
  func.func @transform_1(%arg0: i32) -> (i32, i32) {
    %c0_i32 = arith.constant 0 : i32
    %c0_i32_0 = arith.constant 0 : i32
    %c0_i32_1 = arith.constant 0 : i32
    return %c0_i32, %c0_i32_0 : i32, i32
  }
  func.func @transform_2(%arg0: i32) -> (i32, i32) {
    %c0_i32 = arith.constant 0 : i32
    %c0_i32_0 = arith.constant 0 : i32
    %c0_i32_1 = arith.constant 0 : i32
    return %c0_i32, %c0_i32_0 : i32, i32
  }
  func.func @transform_3(%arg0: i32) -> (i32, i32) {
    %c0_i32 = arith.constant 0 : i32
    %c0_i32_0 = arith.constant 0 : i32
    %c0_i32_1 = arith.constant 0 : i32
    return %c0_i32, %c0_i32_0 : i32, i32
  }
  func.func @transform_4(%arg0: i32) -> (i32, i32) {
    %c0_i32 = arith.constant 0 : i32
    %c0_i32_0 = arith.constant 0 : i32
    %c0_i32_1 = arith.constant 0 : i32
    return %c0_i32, %c0_i32_0 : i32, i32
  }
  func.func @transform_5(%arg0: i32) -> (i32, i32) {
    %c0_i32 = arith.constant 0 : i32
    %c0_i32_0 = arith.constant 0 : i32
    %c0_i32_1 = arith.constant 0 : i32
    return %c0_i32, %c0_i32_0 : i32, i32
  }
  func.func @transform_6(%arg0: i32) -> (i32, i32) {
    %c0_i32 = arith.constant 0 : i32
    %c0_i32_0 = arith.constant 0 : i32
    %c0_i32_1 = arith.constant 0 : i32
    return %c0_i32, %c0_i32_0 : i32, i32
  }
  func.func @transform_7(%arg0: i32) -> (i32, i32) {
    %c0_i32 = arith.constant 0 : i32
    %c0_i32_0 = arith.constant 0 : i32
    return %arg0, %c0_i32 : i32, i32
  }
}

</mosaic_0001>

<bundles_post_ra>
// kernel: actor_forward.1
= control target key start
LH: loop header
LB: loop body
LE: loop exit
PB: predicated region body
PF: predicated region fallthrough
CT: control target
= control target key end

     0   :  { %v550_v0 = vmov 0.0|0.0   ;;  %vm551_vm0 = vmmov 0   ;;  %v552_v4 = vmov 0.0   ;;  %s782_s1 = inlined_call_operand.vmem [shape: f32[128,128], index: 1, kind: input, shape index: {}]   ;;  %s783_s3 = inlined_call_operand.vmem [shape: f32[128,128], index: 3, kind: input, shape index: {}]   ;;  %s784_s0 = inlined_call_operand.vmem [shape: f32[8,128], index: 0, kind: input, shape index: {}]   ;;  %s785_s5 = inlined_call_operand.vmem [shape: f32[128,128], index: 5, kind: input, shape index: {}]   ;;  %s786_s2 = inlined_call_operand.vmem [shape: f32[1,128], index: 2, kind: input, shape index: {}]   ;;  %s787_s4 = inlined_call_operand.vmem [shape: f32[1,128], index: 4, kind: input, shape index: {}]   ;;  %s788_s6 = inlined_call_operand.vmem [shape: f32[1,128], index: 6, kind: input, shape index: {}]   ;;  %s789_s7 = inlined_call_operand.vmem [shape: f32[8,128], index: 7, kind: output, shape index: {}]  }
   0x1   :  { %473 = vmatprep.subr.bf16.mxu0 %v550_v0  ;;  %v27_v1 = vld [vmem:[%s782_s1] sm:$0xff]  ;;  %v28_v2 = vld [vmem:[%s782_s1 + $0x8] sm:$0xff]  ;;  %v29_v3 = vld [vmem:[%s782_s1 + $0x10] sm:$0xff]  ;;  %400 = vmatprep.mubr.msk.f32.mxu0 %vm551_vm0, %v552_v4 }
   0x2   :  { %v474_v5 = vpack.c.bf16 %v28_v2, %v27_v1  ;;  %v30_v6 = vld [vmem:[%s782_s1 + $0x18] sm:$0xff]  ;;  %497 = vmatprep.subr.bf16.mxu1 %v550_v0  ;;  %435 = vmatprep.mubr.msk.f32.mxu1 %vm551_vm0, %v552_v4  ;;  %v31_v8 = vld [vmem:[%s782_s1 + $0x20] sm:$0xff]  ;;  %v32_v9 = vld [vmem:[%s782_s1 + $0x28] sm:$0xff] }
   0x3   :  { %v477_v7 = vpack.c.bf16 %v30_v6, %v29_v3  ;;  %v121_v10 = vld [vmem:[%s783_s3] sm:$0xff]  ;;  %v122_v11 = vld [vmem:[%s783_s3 + $0x8] sm:$0xff]  ;;  %v123_v12 = vld [vmem:[%s783_s3 + $0x10] sm:$0xff]  ;;  %v480_v14 = vpack.c.bf16 %v32_v9, %v31_v8 }
   0x4   :  { %475 = vmatpush3.bf16.msra.mxu0 %v474_v5  ;;  %v124_v13 = vld [vmem:[%s783_s3 + $0x18] sm:$0xff]  ;;  %v498_v15 = vpack.c.bf16 %v122_v11, %v121_v10  ;;  %v33_v16 = vld [vmem:[%s782_s1 + $0x30] sm:$0xff]  ;;  %v125_v19 = vld [vmem:[%s783_s3 + $0x20] sm:$0xff] }
   0x5   :  { %476 = vmatprep.subr.bf16.mxu0 %v550_v0  ;;  %v34_v17 = vld [vmem:[%s782_s1 + $0x38] sm:$0xff]  ;;  %v501_v18 = vpack.c.bf16 %v124_v13, %v123_v12  ;;  %v126_v20 = vld [vmem:[%s783_s3 + $0x28] sm:$0xff]  ;;  %v35_v22 = vld [vmem:[%s782_s1 + $0x40] sm:$0xff] }
   0x6   :  { %499 = vmatpush3.bf16.msra.mxu1 %v498_v15  ;;  %v483_v21 = vpack.c.bf16 %v34_v17, %v33_v16  ;;  %v36_v23 = vld [vmem:[%s782_s1 + $0x48] sm:$0xff]  ;;  %v504_v24 = vpack.c.bf16 %v126_v20, %v125_v19  ;;  %v127_v25 = vld [vmem:[%s783_s3 + $0x30] sm:$0xff]  ;;  %v128_v26 = vld [vmem:[%s783_s3 + $0x38] sm:$0xff] }
   0x7   :  { %500 = vmatprep.subr.bf16.mxu1 %v550_v0  ;;  %v486_v27 = vpack.c.bf16 %v36_v23, %v35_v22  ;;  %v37_v28 = vld [vmem:[%s782_s1 + $0x50] sm:$0xff]  ;;  %v38_v29 = vld [vmem:[%s782_s1 + $0x58] sm:$0xff]  ;;  %v507_v30 = vpack.c.bf16 %v128_v26, %v127_v25  ;;  %v129_v31 = vld [vmem:[%s783_s3 + $0x40] sm:$0xff] }
   0x8   :  { %478 = vmatpush3.bf16.msra.mxu0 %v477_v7  ;;  %v130_v32 = vld [vmem:[%s783_s3 + $0x48] sm:$0xff]  ;;  %v489_v33 = vpack.c.bf16 %v38_v29, %v37_v28  ;;  %v39_v34 = vld [vmem:[%s782_s1 + $0x60] sm:$0xff]  ;;  %v131_v37 = vld [vmem:[%s783_s3 + $0x50] sm:$0xff] }
   0x9   :  { %479 = vmatprep.subr.bf16.mxu0 %v550_v0  ;;  %v40_v35 = vld [vmem:[%s782_s1 + $0x68] sm:$0xff]  ;;  %v510_v36 = vpack.c.bf16 %v130_v32, %v129_v31  ;;  %v132_v38 = vld [vmem:[%s783_s3 + $0x58] sm:$0xff]  ;;  %v41_v40 = vld [vmem:[%s782_s1 + $0x70] sm:$0xff] }
   0xa   :  { %502 = vmatpush3.bf16.msra.mxu1 %v501_v18  ;;  %v492_v39 = vpack.c.bf16 %v40_v35, %v39_v34  ;;  %v42_v41 = vld [vmem:[%s782_s1 + $0x78] sm:$0xff]  ;;  %v513_v42 = vpack.c.bf16 %v132_v38, %v131_v37  ;;  %v133_v43 = vld [vmem:[%s783_s3 + $0x60] sm:$0xff]  ;;  %v134_v44 = vld [vmem:[%s783_s3 + $0x68] sm:$0xff] }
   0xb   :  { %503 = vmatprep.subr.bf16.mxu1 %v550_v0  ;;  %v495_v45 = vpack.c.bf16 %v42_v41, %v41_v40  ;;  %v516_v46 = vpack.c.bf16 %v134_v44, %v133_v43  ;;  %v26_v47 = vld [vmem:[%s784_s0] sm:$0xff]  ;;  %v135_v48 = vld [vmem:[%s783_s3 + $0x70] sm:$0xff]  ;;  %v136_v49 = vld [vmem:[%s783_s3 + $0x78] sm:$0xff] }
   0xc   :  { %481 = vmatpush3.bf16.msra.mxu0 %v480_v14  ;;  %v519_v50 = vpack.c.bf16 %v136_v49, %v135_v48  ;;  %v215_v51 = vld [vmem:[%s785_s5] sm:$0xff]  ;;  %v216_v52 = vld [vmem:[%s785_s5 + $0x8] sm:$0xff]  ;;  %v217_v53 = vld [vmem:[%s785_s5 + $0x10] sm:$0xff] }
   0xd   :  { %482 = vmatprep.subr.bf16.mxu0 %v550_v0  ;;  %v522_v54 = vpack.c.bf16 %v216_v52, %v215_v51  ;;  %v218_v55 = vld [vmem:[%s785_s5 + $0x18] sm:$0xff]  ;;  %v219_v57 = vld [vmem:[%s785_s5 + $0x20] sm:$0xff]  ;;  %v220_v58 = vld [vmem:[%s785_s5 + $0x28] sm:$0xff] }
   0xe   :  { %505 = vmatpush3.bf16.msra.mxu1 %v504_v24  ;;  %v525_v56 = vpack.c.bf16 %v218_v55, %v217_v53  ;;  %v528_v59 = vpack.c.bf16 %v220_v58, %v219_v57  ;;  %v221_v60 = vld [vmem:[%s785_s5 + $0x30] sm:$0xff]  ;;  %v222_v61 = vld [vmem:[%s785_s5 + $0x38] sm:$0xff]  ;;  %v223_v63 = vld [vmem:[%s785_s5 + $0x40] sm:$0xff] }
   0xf   :  { %506 = vmatprep.subr.bf16.mxu1 %v550_v0  ;;  %v531_v62 = vpack.c.bf16 %v222_v61, %v221_v60  ;;  %v224_v1 = vld [vmem:[%s785_s5 + $0x48] sm:$0xff]  ;;  %v225_v3 = vld [vmem:[%s785_s5 + $0x50] sm:$0xff]  ;;  %v227_v6 = vld [vmem:[%s785_s5 + $0x60] sm:$0xff] }
  0x10   :  { %484 = vmatpush3.bf16.msra.mxu0 %v483_v21  ;;  %v534_v2 = vpack.c.bf16 %v224_v1, %v223_v63  ;;  %v228_v7 = vld [vmem:[%s785_s5 + $0x68] sm:$0xff]  ;;  %v314_v9 = vld [vmem:[%s786_s2] ss:$0 sm:$0xff]  ;;  %v229_v14 = vld [vmem:[%s785_s5 + $0x70] sm:$0xff] }
  0x11   :  { %485 = vmatprep.subr.bf16.mxu0 %v550_v0  ;;  %v540_v8 = vpack.c.bf16 %v228_v7, %v227_v6  ;;  %v230_v15 = vld [vmem:[%s785_s5 + $0x78] sm:$0xff]  ;;  %v316_v21 = vld [vmem:[%s788_s6] ss:$0 sm:$0xff] }
  0x12   :  { %508 = vmatpush3.bf16.msra.mxu1 %v507_v30  ;;  %v543_v16 = vpack.c.bf16 %v230_v15, %v229_v14 }
  0x13   :  { %509 = vmatprep.subr.bf16.mxu1 %v550_v0 }
  0x14   :  { %487 = vmatpush3.bf16.msra.mxu0 %v486_v27 }
  0x15   :  { %488 = vmatprep.subr.bf16.mxu0 %v550_v0 }
  0x16   :  { %511 = vmatpush3.bf16.msra.mxu1 %v510_v36 }
  0x17   :  { %512 = vmatprep.subr.bf16.mxu1 %v550_v0 }
  0x18   :  { %490 = vmatpush3.bf16.msra.mxu0 %v489_v33 }
  0x19   :  { %491 = vmatprep.subr.bf16.mxu0 %v550_v0 }
  0x1a   :  { %514 = vmatpush3.bf16.msra.mxu1 %v513_v42 }
  0x1b   :  { %515 = vmatprep.subr.bf16.mxu1 %v550_v0 }
  0x1c   :  { %493 = vmatpush3.bf16.msra.mxu0 %v492_v39 }
  0x1d   :  { %494 = vmatprep.subr.bf16.mxu0 %v550_v0 }
  0x1e   :  { %517 = vmatpush3.bf16.msra.mxu1 %v516_v46 }
  0x1f   :  { %518 = vmatprep.subr.bf16.mxu1 %v550_v0 }
  0x20   :  { %496 = vmatpush3.bf16.msra.mxu0 %v495_v45 }
  0x21   :  { %521 = vmatprep.subr.bf16.mxu0 %v550_v0 }
  0x22   :  { %520 = vmatpush3.bf16.msra.mxu1 %v519_v50 }
  0x23   :  { %401 = vmatmul.mubr.f32.vlgmr.msra.gmra.mrb[0].mxu0 %v26_v47 }
  0x24   :  { %470 = vmatprep.mubr.msk.f32.mxu0 %vm551_vm0, %v552_v4  ;;  %523 = vmatpush3.bf16.msra.mxu0 %v522_v54  ;;  %v226_v4 = vld [vmem:[%s785_s5 + $0x58] sm:$0xff] }
  0x25   :  { %524 = vmatprep.subr.bf16.mxu0 %v550_v0  ;;  %v537_v5 = vpack.c.bf16 %v226_v4, %v225_v3 }
  0x28   :  { %526 = vmatpush3.bf16.msra.mxu0 %v525_v56 }
  0x29   :  { %527 = vmatprep.subr.bf16.mxu0 %v550_v0 }
  0x2c   :  { %529 = vmatpush3.bf16.msra.mxu0 %v528_v59 }
  0x2d   :  { %530 = vmatprep.subr.bf16.mxu0 %v550_v0 }
  0x30   :  { %532 = vmatpush3.bf16.msra.mxu0 %v531_v62 }
  0x31   :  { %533 = vmatprep.subr.bf16.mxu0 %v550_v0 }
  0x34   :  { %535 = vmatpush3.bf16.msra.mxu0 %v534_v2 }
  0x35   :  { %536 = vmatprep.subr.bf16.mxu0 %v550_v0 }
  0x38   :  { %538 = vmatpush3.bf16.msra.mxu0 %v537_v5 }
  0x39   :  { %539 = vmatprep.subr.bf16.mxu0 %v550_v0 }
  0x3c   :  { %541 = vmatpush3.bf16.msra.mxu0 %v540_v8 }
  0x3d   :  { %542 = vmatprep.subr.bf16.mxu0 %v550_v0  ;;  %v315_v0 = vld [vmem:[%s787_s4] ss:$0 sm:$0xff] }
  0x40   :  { %544 = vmatpush3.bf16.msra.mxu0 %v543_v16 }
  0xf6   :  { %v116_v10 = vpop.f32.mrb[0].mxu0 }
  0xf7   :  { %v117_v11 = vadd.f32 %v314_v9, %v116_v10  ;;  %v402_v12 = vpop.f32.mrb[1].mxu0 }
  0xf9   :  { %v120_v13 = vmax.f32 %v117_v11, 0.0 }
  0xfb   :  { %436 = vmatmul.mubr.f32.vlgmr.msra.gmra.mrb[0].mxu1 %v120_v13 }
 0x1ce   :  { %v210_v17 = vpop.f32.mrb[0].mxu1 }
 0x1cf   :  { %v211_v18 = vadd.f32 %v315_v0, %v210_v17  ;;  %v437_v19 = vpop.f32.mrb[1].mxu1 }
 0x1d1   :  { %v214_v20 = vmax.f32 %v211_v18, 0.0 }
 0x1d3   :  { %471 = vmatmul.mubr.f32.vlgmr.msra.gmra.mrb[2].mxu0 %v214_v20 }
 0x2a6   :  { %v304_v22 = vpop.f32.mrb[2].mxu0 }
 0x2a7   :  { %v305_v23 = vadd.f32 %v316_v21, %v304_v22  ;;  %v472_v24 = vpop.f32.mrb[3].mxu0 }
 0x2a9   :  { %548 = vtanh.f32 %v305_v23 }
 0x2b3   :  { %v549_v25 = vpop.eup %548 }
 0x2b4   :  { %309 = vst [vmem:[%s789_s7] sm:$0xff] %v549_v25 }

</bundles_post_ra>
